<compile_context>
chip_gen: v7x
topology: tpu7x:2x2x1
jax: 0.10.0
libtpu: 0.0.40
codegen_flags: <defaults>
</compile_context>

<pallas_src>
import math

import jax
import jax.numpy as jnp
import numpy as np
from jax import lax
from jax.experimental import pallas as pl
from jax.experimental.pallas import tpu as pltpu


# ---------------------------------------------------------------------------
# Weight construction (matches GaussianSmoothing.__init__, dim=2)
# ---------------------------------------------------------------------------
def gaussian_taps_1d(size: int, sigma: float):
    """Normalized 1-D taps. The module's 2-D kernel is exactly the outer product of these."""
    mean = (size - 1) / 2
    raw = [math.exp(-(((i - mean) / (2.0 * sigma)) ** 2)) for i in range(size)]
    s = sum(raw)
    return [v / s for v in raw]  # Python floats -> compile-time constants in the kernel


def build_gaussian_weight(channels: int = 1, kernel_size: int = 3, sigma: float = 0.5, dim: int = 2):
    """Reference 2-D weight, identical math to the PyTorch module (for the correctness check)."""
    sizes = [kernel_size] * dim
    sigmas = [sigma] * dim
    kernel = jnp.ones((), dtype=jnp.float32)
    meshgrids = jnp.meshgrid(*[jnp.arange(s, dtype=jnp.float32) for s in sizes], indexing="ij")
    for size, std, mgrid in zip(sizes, sigmas, meshgrids):
        mean = (size - 1) / 2
        kernel = kernel * (
            1.0 / (std * math.sqrt(2 * math.pi)) * jnp.exp(-(((mgrid - mean) / (2 * std)) ** 2))
        )
    kernel = kernel / jnp.sum(kernel)
    return jnp.broadcast_to(kernel, (channels,) + kernel.shape).astype(jnp.float32)  # (C,K,K)


# ---------------------------------------------------------------------------
# Tile picker
# ---------------------------------------------------------------------------
def _pick_rows(B, per_row_bytes, *, budget_bytes=4 << 20, min_steps=4, row_align=1):
    """Fused-batch rows per block: fits the VMEM budget, gives >= min_steps grid steps when
    possible, and respects the (8,128)-style sublane alignment when the rows dim is the
    second-to-last block dim (row_align > 1). Grid uses pl.cdiv, so rows need not divide B."""
    rows = max(1, int(budget_bytes) // max(1, int(per_row_bytes)))   # VMEM budget
    rows = min(rows, max(1, B // min_steps))                          # prefer multiple grid steps
    if rows >= B:
        return B                                                      # block dim == full dim: legal
    if row_align > 1:
        rows = (rows // row_align) * row_align
        if rows == 0:
            rows = row_align if row_align < B else B
    return max(1, rows)


def _row_align_for(dtype) -> int:
    itemsize = jnp.dtype(dtype).itemsize
    return 8 * max(1, 4 // itemsize)  # f32 -> 8, bf16 -> 16, fp8/int8 -> 32 (sublane packing)


# ---------------------------------------------------------------------------
# Pallas kernels
# ---------------------------------------------------------------------------
def _smooth_flat(x, taps, K):
    """W < 128: lane-dense flattened layout (tb, H*W). Row crop done in kernel (prefix store),
    only the column crop remains in the wrapper."""
    N, C, H, W = x.shape
    Ho, Wo = H - K + 1, W - K + 1
    B, HW, HoW = N * C, H * W, Ho * W
    itemsize = jnp.dtype(x.dtype).itemsize

    per_row = 2 * (HW + HoW) * itemsize + 3 * HW * 4  # double-buffered in/out + f32 intermediates
    tb = _pick_rows(B, per_row, budget_bytes=4 << 20, min_steps=4, row_align=_row_align_for(x.dtype))
    grid = (pl.cdiv(B, tb),)

    x_flat = x.reshape(B, HW)  # free reshape: contiguous NCHW -> (N*C, H*W)

    def kernel(x_ref, o_ref):
        xv = x_ref[...].astype(jnp.float32)                 # (tb, H*W), accumulate in f32
        # Vertical pass: acc[p] = sum_i taps[i] * x[p + i*W], valid for p in [0, Ho*W).
        acc = taps[0] * xv[:, 0:HoW]
        for i in range(1, K):
            acc = acc + taps[i] * xv[:, i * W: i * W + HoW]
        # Pad K-1 lanes so every horizontal slice has length Ho*W (tail lands in cropped columns).
        if K > 1:
            acc = jnp.concatenate(
                [acc, jnp.zeros((acc.shape[0], K - 1), jnp.float32)], axis=1)
        # Horizontal pass: out[p] = sum_j taps[j] * acc[p + j].
        out = taps[0] * acc[:, 0:HoW]
        for j in range(1, K):
            out = out + taps[j] * acc[:, j: j + HoW]
        o_ref[...] = out.astype(o_ref.dtype)                # only the valid-row prefix is stored

    out_flat = pl.pallas_call(
        kernel,
        out_shape=jax.ShapeDtypeStruct((B, HoW), x.dtype),
        grid=grid,
        in_specs=[pl.BlockSpec((tb, HW), lambda b: (b, 0))],
        out_specs=pl.BlockSpec((tb, HoW), lambda b: (b, 0)),
        compiler_params=pltpu.CompilerParams(
            dimension_semantics=("parallel",),   # fused-batch axis is independent (v7x megacore)
            vmem_limit_bytes=32 << 20,           # safe on v7x (64 MiB VMEM); headroom elsewhere
        ),
        cost_estimate=pl.CostEstimate(
            flops=4 * K * B * Ho * Wo,
            transcendentals=0,
            bytes_accessed=(B * HW + B * HoW) * itemsize,
        ),
    )(x_flat)

    # Only the cheap column crop remains (rows already cropped in-kernel).
    return out_flat.reshape(N, C, Ho, W)[:, :, :, :Wo]


def _smooth_wide(x, taps, K):
    """W >= 128: (tb, H, W) layout, W lane-dense, H on sublanes. The valid (Ho, Wo) window is
    written directly from the kernel -> no wrapper crop at all."""
    # TODO(synk): very large images (a single (H, W) f32 plane near/over VMEM) need 2-D spatial
    # tiling with a (K-1) halo; not implemented here.
    N, C, H, W = x.shape
    Ho, Wo = H - K + 1, W - K + 1
    B = N * C
    itemsize = jnp.dtype(x.dtype).itemsize

    per_img = 2 * (H * W + Ho * Wo) * itemsize + 3 * H * W * 4
    tb = _pick_rows(B, per_img, budget_bytes=4 << 20, min_steps=4, row_align=1)
    grid = (pl.cdiv(B, tb),)

    x3 = x.reshape(B, H, W)

    def kernel(x_ref, o_ref):
        xv = x_ref[...].astype(jnp.float32)                 # (tb, H, W)
        # Vertical pass over sublanes (rows).
        acc = taps[0] * xv[:, 0:Ho, :]
        for i in range(1, K):
            acc = acc + taps[i] * xv[:, i: i + Ho, :]
        # Horizontal pass over lanes (cols); Wo + K - 1 == W, so all slices are in bounds.
        out = taps[0] * acc[:, :, 0:Wo]
        for j in range(1, K):
            out = out + taps[j] * acc[:, :, j: j + Wo]
        o_ref[...] = out.astype(o_ref.dtype)                # valid window only

    out = pl.pallas_call(
        kernel,
        out_shape=jax.ShapeDtypeStruct((B, Ho, Wo), x.dtype),
        grid=grid,
        in_specs=[pl.BlockSpec((tb, H, W), lambda b: (b, 0, 0))],
        out_specs=pl.BlockSpec((tb, Ho, Wo), lambda b: (b, 0, 0)),
        compiler_params=pltpu.CompilerParams(
            dimension_semantics=("parallel",),
            vmem_limit_bytes=32 << 20,
        ),
        cost_estimate=pl.CostEstimate(
            flops=4 * K * B * Ho * Wo,
            transcendentals=0,
            bytes_accessed=(B * H * W + B * Ho * Wo) * itemsize,
        ),
    )(x3)

    return out.reshape(N, C, Ho, Wo)


def gaussian_smoothing(x, kernel_size: int = 3, sigma: float = 0.5):
    """Depthwise 2-D 'valid' Gaussian conv, identical semantics to the module's forward (dim=2).

    The depthwise weight is the same KxK separable Gaussian for every channel, so the channel
    grid is collapsed into a fused batch dim and the taps are compile-time constants."""
    # TODO(synk): dim=1 / dim=3 variants of the module are not implemented (2-D spatial only).
    N, C, H, W = x.shape
    K = int(kernel_size)
    assert H >= K and W >= K, "valid conv needs spatial dims >= kernel_size"
    taps = gaussian_taps_1d(K, sigma)

    if W >= 128:
        return _smooth_wide(x, taps, K)
    return _smooth_flat(x, taps, K)


# ---------------------------------------------------------------------------
# Demo + correctness checks
# ---------------------------------------------------------------------------
if __name__ == "__main__":
    key = jax.random.PRNGKey(0)

    configs = [
        (2, 4, 16, 16),     # primary demo shape (attend-&-excite attention maps), flat path
        (2, 32, 16, 16),    # multi-step grid on the flat path
        (2, 5, 12, 10),     # odd dims + ragged (cdiv) grid on the flat path
        (1, 2, 16, 128),    # wide path (W >= 128): full in-kernel crop
    ]
    K, SIGMA = 3, 0.5
    for idx, (N, C, H, W) in enumerate(configs):
        x = jax.random.normal(jax.random.fold_in(key, idx), (N, C, H, W), dtype=jnp.float32)
        out = jax.block_until_ready(gaussian_smoothing(x, kernel_size=K, sigma=SIGMA))

        # Reference: XLA depthwise conv with the module's exact 2-D weight (groups=C, no padding).
        weight = build_gaussian_weight(channels=C, kernel_size=K, sigma=SIGMA, dim=2)  # (C,K,K)
        ref = lax.conv_general_dilated(
            x,
            weight[:, None, :, :],          # (O=C, I/groups=1, K, K)
            window_strides=(1, 1),
            padding="VALID",
            dimension_numbers=("NCHW", "OIHW", "NCHW"),
            feature_group_count=C,
            precision=lax.Precision.HIGHEST,
        )

        assert out.shape == (N, C, H - K + 1, W - K + 1)
        np.testing.assert_allclose(np.asarray(out), np.asarray(ref), rtol=1e-5, atol=1e-5)

    print("KERNEL_OK")
</pallas_src>

<mosaic_0001>
module attributes {stable_mosaic.version = 11 : i64} {
  func.func @kernel(%arg0: i32, %arg1: memref<8x256xf32, #tpu.memory_space<vmem>>, %arg2: memref<8x224xf32, #tpu.memory_space<vmem>>) attributes {dimension_semantics = [#tpu.dimension_semantics<parallel>], iteration_bounds = array<i64: 1>, scalar_prefetch = 0 : i64, scratch_operands = 0 : i64, tpu.core_type = #tpu.core_type<tc>, window_params = [{transform_indices = @transform_0, window_bounds = array<i64: 8, 256>}, {transform_indices = @transform_1, window_bounds = array<i64: 8, 224>}]} {
    %c0 = arith.constant 0 : index
    %c0_0 = arith.constant 0 : index
    %0 = vector.load %arg1[%c0, %c0_0] : memref<8x256xf32, #tpu.memory_space<vmem>>, vector<8x256xf32>
    %1 = vector.extract_strided_slice %0 {offsets = [0, 0], sizes = [8, 224], strides = [1, 1]} : vector<8x256xf32> to vector<8x224xf32>
    %cst = arith.constant 0.211941555 : f32
    %2 = vector.broadcast %cst : f32 to vector<8x224xf32>
    %3 = arith.mulf %2, %1 : vector<8x224xf32>
    %4 = vector.extract_strided_slice %0 {offsets = [0, 16], sizes = [8, 224], strides = [1, 1]} : vector<8x256xf32> to vector<8x224xf32>
    %cst_1 = arith.constant 0.57611686 : f32
    %5 = vector.broadcast %cst_1 : f32 to vector<8x224xf32>
    %6 = arith.mulf %5, %4 : vector<8x224xf32>
    %7 = arith.addf %3, %6 : vector<8x224xf32>
    %8 = vector.extract_strided_slice %0 {offsets = [0, 32], sizes = [8, 224], strides = [1, 1]} : vector<8x256xf32> to vector<8x224xf32>
    %cst_2 = arith.constant 0.211941555 : f32
    %9 = vector.broadcast %cst_2 : f32 to vector<8x224xf32>
    %10 = arith.mulf %9, %8 : vector<8x224xf32>
    %11 = arith.addf %7, %10 : vector<8x224xf32>
    %cst_3 = arith.constant 0.000000e+00 : f32
    %12 = vector.broadcast %cst_3 : f32 to vector<8x2xf32>
    %13 = tpu.concatenate %11, %12 in 1 : vector<8x224xf32>, vector<8x2xf32> -> vector<8x226xf32>
    %14 = vector.extract_strided_slice %13 {offsets = [0, 0], sizes = [8, 224], strides = [1, 1]} : vector<8x226xf32> to vector<8x224xf32>
    %cst_4 = arith.constant 0.211941555 : f32
    %15 = vector.broadcast %cst_4 : f32 to vector<8x224xf32>
    %16 = arith.mulf %15, %14 : vector<8x224xf32>
    %17 = vector.extract_strided_slice %13 {offsets = [0, 1], sizes = [8, 224], strides = [1, 1]} : vector<8x226xf32> to vector<8x224xf32>
    %cst_5 = arith.constant 0.57611686 : f32
    %18 = vector.broadcast %cst_5 : f32 to vector<8x224xf32>
    %19 = arith.mulf %18, %17 : vector<8x224xf32>
    %20 = arith.addf %16, %19 : vector<8x224xf32>
    %21 = vector.extract_strided_slice %13 {offsets = [0, 2], sizes = [8, 224], strides = [1, 1]} : vector<8x226xf32> to vector<8x224xf32>
    %cst_6 = arith.constant 0.211941555 : f32
    %22 = vector.broadcast %cst_6 : f32 to vector<8x224xf32>
    %23 = arith.mulf %22, %21 : vector<8x224xf32>
    %24 = arith.addf %20, %23 : vector<8x224xf32>
    %c0_7 = arith.constant 0 : index
    %c0_8 = arith.constant 0 : index
    %25 = vector.load %arg2[%c0_7, %c0_8] : memref<8x224xf32, #tpu.memory_space<vmem>>, vector<8x224xf32>
    tpu.vector_store %arg2[%c0_7, %c0_8], %24 {strides = array<i32>} : memref<8x224xf32, #tpu.memory_space<vmem>>, vector<8x224xf32>,
    return
  }
  func.func @transform_0(%arg0: i32) -> (i32, i32) {
    %c0_i32 = arith.constant 0 : i32
    %c0_i32_0 = arith.constant 0 : i32
    return %arg0, %c0_i32 : i32, i32
  }
  func.func @transform_1(%arg0: i32) -> (i32, i32) {
    %c0_i32 = arith.constant 0 : i32
    %c0_i32_0 = arith.constant 0 : i32
    return %arg0, %c0_i32 : i32, i32
  }
}

</mosaic_0001>

<bundles_post_ra>
// kernel: tpu_custom_call.1
= control target key start
LH: loop header
LB: loop body
LE: loop exit
PB: predicated region body
PF: predicated region fallthrough
CT: control target
= control target key end

     0   :  { %6 = vsyncpa [#allocation3], 0  ;;  %s194_s0 = inlined_call_operand.hbm [shape: f32[8,256], index: 0, kind: input, shape index: {}]   ;;  %s195_s1 = inlined_call_operand.hbm [shape: f32[8,224], index: 1, kind: output, shape index: {}]  }
   0x1   :  { %7 = vsyncpa [#allocation4], 0  ;;  %s151_s6 = smov [#allocation2]   ;;  %s103_s10 = scalar_lea.hbm %s194_s0, 256 }
   0x2   :  { %s14_s7 = sshll.u32 %s151_s6, 4  ;;  %p104_p0 = scmp.ne.s32.totalorder %s194_s0, %s103_s10  ;;  %s15_s7 = int_to_ptr.vmem [resolvable:$true] %s14_s7 }
   0x3   :  { %p107_p1 = scmp.lt.u32.totalorder %s103_s10, %s194_s0 }
   0x5   :  { %p109_p2 = pnand %p107_p1, %p104_p0 }
   0x7   :  { %112 = shalt.err (!%p109_p2)
}
   0x8   :  { %s113_s15 = scalar_lea.vmem %s15_s7, 256  ;;  %p118_p4 = scmp.lt.s32.totalorder %s15_s7, %s15_s7 }
   0x9   :  { %p114_p3 = scmp.ne.s32.totalorder %s15_s7, %s113_s15  ;;  %p119_p5 = scmp.lt.s32.totalorder %s113_s15, %s113_s15 }
   0xb   :  { %p120_p6 = por %p119_p5, %p118_p4 }
   0xd   :  { %p121_p7 = pnand %p120_p6, %p114_p3 }
   0xf   :  { %124 = shalt.err (!%p121_p7)
}
  0x10   :  { %17 = dma.hbm_to_vmem [thread:$0]  %s194_s0, 256, %s15_s7, [#allocation3]  }
  0x11   :  { %147 = dma.done.wait [#allocation3], 256  }
  0x12   :  { %148 = vsyncadd [#allocation3], 4294967040  ;;  %v21_v0 = vld [vmem:[#allocation2] sm:$0xff]  ;;  %v22_v1 = vld [vmem:[#allocation2 + $0x8] sm:$0xff]  ;;  %s152_s18 = smov 112   ;;  %s153_s19 = smov 96  }
  0x13   :  { %v25_v2 = vmul.f32 0.57611686, %v21_v0  ;;  %v23_v3 = vmul.f32 0.21194156, %v21_v0  ;;  %v26_v4 = vmul.f32 0.57611686, %v22_v1 }
  0x14   :  { %v24_v5 = vmul.f32 0.21194156, %v22_v1  ;;  %vm33_vm0 = vcmask 916480   ;;  %vm45_vm1 = vcmask 785408   ;;  %s154_s0 = smov 127   ;;  %s155_s20 = smov 126  }
  0x15   :  { %29 = vrot.lane.b32.xlu0 %v25_v2, %s152_s18  ;;  %41 = vrot.lane.b32.xlu1 %v23_v3, %s153_s19  ;;  %vm62_vm2 = vcmask 1039360   ;;  %vm74_vm3 = vcmask 1031168   ;;  %s156_s21 = smov [#allocation5]  }
  0x16   :  { %s88_s22 = sshll.u32 %s156_s21, 4  ;;  %s89_s22 = int_to_ptr.vmem [resolvable:$true] %s88_s22 }
  0x17   :  { %s125_s23 = scalar_lea.vmem %s89_s22, 256  ;;  %p130_p9 = scmp.lt.s32.totalorder %s89_s22, %s89_s22 }
  0x18   :  { %p126_p8 = scmp.ne.s32.totalorder %s89_s22, %s125_s23  ;;  %p131_p10 = scmp.lt.s32.totalorder %s125_s23, %s125_s23 }
  0x19   :  { %31 = vrot.lane.b32.xlu0 %v26_v4, %s152_s18  ;;  %43 = vrot.lane.b32.xlu1 %v24_v5, %s153_s19 }
  0x1a   :  { %p132_p11 = por %p131_p10, %p130_p9 }
  0x1c   :  { %p133_p12 = pnand %p132_p11, %p126_p8 }
  0x87   :  { %v30_v6 = vpop.permute.xlu0 %29  ;;  %v42_v7 = vpop.permute.xlu1 %41 }
  0x8b   :  { %v32_v8 = vpop.permute.xlu0 %31  ;;  %v44_v9 = vpop.permute.xlu1 %43 }
  0x8c   :  { %v34_v10 = vsel %vm33_vm0, %v30_v6, %v32_v8  ;;  %v38_v11 = vadd.f32 %v32_v8, %v24_v5  ;;  %v46_v13 = vsel %vm45_vm1, %v42_v7, %v44_v9 }
  0x8d   :  { %v37_v12 = vadd.f32 %v34_v10, %v23_v3 }
  0x8e   :  { %v50_v14 = vadd.f32 %v44_v9, %v38_v11 }
  0x8f   :  { %v49_v15 = vadd.f32 %v46_v13, %v37_v12 }
  0x90   :  { %v51_v16 = vsel %vm45_vm1, %v50_v14, 0.0 }
  0x91   :  { %v55_v17 = vmul.f32 0.57611686, %v51_v16  ;;  %v54_v18 = vmul.f32 0.57611686, %v49_v15  ;;  %v53_v19 = vmul.f32 0.21194156, %v51_v16 }
  0x92   :  { %v52_v20 = vmul.f32 0.21194156, %v49_v15 }
  0x93   :  { %60 = vrot.lane.b32.xlu1 %v55_v17, %s154_s0  ;;  %58 = vrot.lane.b32.xlu0 %v54_v18, %s154_s0 }
  0x97   :  { %72 = vrot.lane.b32.xlu1 %v53_v19, %s155_s20  ;;  %70 = vrot.lane.b32.xlu0 %v52_v20, %s155_s20 }
 0x105   :  { %v61_v21 = vpop.permute.xlu1 %60  ;;  %v59_v22 = vpop.permute.xlu0 %58 }
 0x106   :  { %v63_v23 = vsel %vm62_vm2, %v59_v22, %v61_v21  ;;  %v67_v24 = vadd.f32 %v61_v21, %v53_v19 }
 0x107   :  { %v66_v25 = vadd.f32 %v63_v23, %v52_v20 }
 0x109   :  { %v73_v26 = vpop.permute.xlu1 %72  ;;  %v71_v27 = vpop.permute.xlu0 %70 }
 0x10a   :  { %v79_v28 = vadd.f32 %v73_v26, %v67_v24  ;;  %v75_v29 = vsel %vm74_vm3, %v71_v27, %v73_v26 }
 0x10b   :  { %v78_v30 = vadd.f32 %v75_v29, %v66_v25 }
 0x10c   :  { %81 = vst.msk [vmem:[#allocation5 + $0x8] sm:$0xff] %vm45_vm1, %v79_v28 }
 0x10d   :  { %80 = vst [vmem:[#allocation5] sm:$0xff] %v78_v30 }
 0x10e   :  { %136 = shalt.err (!%p133_p12)
}
 0x10f   :  { %s137_s26 = scalar_lea.hbm %s195_s1, 256 }
 0x110   :  { %p138_p13 = scmp.ne.s32.totalorder %s195_s1, %s137_s26  ;;  %p141_p0 = scmp.lt.u32.totalorder %s137_s26, %s195_s1 }
 0x112   :  { %p143_p1 = pnand %p141_p0, %p138_p13 }
 0x114   :  { %146 = shalt.err (!%p143_p1)
}
 0x115   :  { %91 = dma.vmem_to_hbm [thread:$0]  %s89_s22, 256, %s195_s1, [#allocation4]  }
 0x116   :  { %149 = dma.done.wait [#allocation4], 256  }
 0x117   :  { %150 = vsyncadd [#allocation4], 4294967040 }
 0x118   :  { %95 = vsyncpa [#allocation3], 1 }
 0x119   :  { %96 = vsyncpa [#allocation4], 1 }

</bundles_post_ra>
